<compile_context>
chip_gen: v6e
topology: v6e:2x2x1
jax: 0.10.0
libtpu: 0.0.40
codegen_flags: <defaults>
</compile_context>

<pallas_src>
import jax
import jax.numpy as jnp
from jax.experimental import pallas as pl
from jax.experimental.pallas import tpu as pltpu

LANE = 128


def _round_up(x, m):
    return ((x + m - 1) // m) * m


def _make_graphsage_kernel(n_layers, p):
    """Fused n-layer SAGEConv("mean") + ReLU kernel, everything resident in VMEM.

    Ref order: adj (N,N) bf16, h0 (N,P) f32,
               w_cat[0..L-1] (2P,P) f32, b[0..L-1] (1,P) f32,
               out (N,P) f32, x_scratch (N,2P) f32.
    w_cat = [[W_self.T padded], [W_neigh.T padded]] stacked along the input (K) axis.
    """

    def kernel(*refs):
        adj_ref = refs[0]
        h_ref = refs[1]
        w_refs = refs[2:2 + n_layers]
        b_refs = refs[2 + n_layers:2 + 2 * n_layers]
        out_ref = refs[2 + 2 * n_layers]
        x_scratch = refs[2 + 2 * n_layers + 1]

        adj = adj_ref[...]                                    # (N, N) bf16, exact for 0/1 edges
        # Degree via an f32-accumulating reduce; no standalone f32 adjacency buffer is kept
        # live across the layer loop (and no a_norm multiply).
        deg = jnp.sum(adj, axis=-1, keepdims=True, dtype=jnp.float32)    # (N, 1)
        # neigh_sum is exactly 0 when deg == 0, so no select is needed.
        inv_deg = pl.reciprocal(jnp.maximum(deg, 1.0), approx=False)     # (N, 1)

        h = h_ref[...]                                        # (N, P), lane-padded
        x_scratch[:, :p] = h                                  # stage "self" half (lane-dense)
        for l in range(n_layers):
            # Mean aggregation: bf16 adjacency on the MXU LHS, f32 accumulate, then a cheap
            # O(N*P) post-matmul normalization (matches the reference's rounding order).
            h_neigh = inv_deg * jnp.dot(adj, h, preferred_element_type=jnp.float32)
            x_scratch[:, p:] = h_neigh                        # stage "neigh" half
            # Fused self/neighbor projection: K = 2P fills the 256-deep MXU (v6e/v7x).
            z = jnp.dot(x_scratch[...], w_refs[l][...],
                        preferred_element_type=jnp.float32) + b_refs[l][...]
            h = jnp.maximum(z, 0.0)                           # ReLU (padded cols stay 0)
            if l + 1 < n_layers:
                x_scratch[:, :p] = h                          # feed next layer's self half
            else:
                out_ref[...] = h

    return kernel


def _pack_params(params, p):
    """Pad + stack per-layer weights to (2P, P) and biases to (1, P)."""
    w_cats, biases = [], []
    for (w_self, w_neigh, bias) in params:
        f_in, f_out = w_self.shape
        w_cat = jnp.zeros((2 * p, p), jnp.float32)
        w_cat = w_cat.at[:f_in, :f_out].set(w_self)           # rows 0..P-1   <- self path
        w_cat = w_cat.at[p:p + f_in, :f_out].set(w_neigh)     # rows P..2P-1  <- neigh path
        b = jnp.zeros((1, p), jnp.float32).at[:, :f_out].set(bias)
        w_cats.append(w_cat)
        biases.append(b)
    return w_cats, biases


def graphsage_forward(adj, in_feat, params):
    """Full GraphSAGE forward: h = ReLU(SAGEConv(g, h)) for each layer, one fused kernel."""
    N = adj.shape[0]
    n_layers = len(params)
    f_out_final = params[-1][0].shape[1]
    dims = [params[0][0].shape[0]] + [w.shape[1] for (w, _, _) in params]
    p = _round_up(max(dims), LANE)                            # common lane-padded width

    # Host-side packing / padding (cheap XLA ops, done once per call).
    h0 = jnp.zeros((N, p), jnp.float32).at[:, :in_feat.shape[1]].set(in_feat)
    w_cats, biases = _pack_params(params, p)
    adj_bf16 = adj.astype(jnp.bfloat16)                       # exact for 0/1 edge weights only

    in_specs = [
        pl.BlockSpec((N, N), lambda: (0, 0)),
        pl.BlockSpec((N, p), lambda: (0, 0)),
    ]
    args = [adj_bf16, h0]
    for w_cat in w_cats:
        in_specs.append(pl.BlockSpec((2 * p, p), lambda: (0, 0)))
        args.append(w_cat)
    for b in biases:
        in_specs.append(pl.BlockSpec((1, p), lambda: (0, 0)))
        args.append(b)

    out = pl.pallas_call(
        _make_graphsage_kernel(n_layers, p),
        out_shape=jax.ShapeDtypeStruct((N, p), jnp.float32),
        in_specs=in_specs,
        out_specs=pl.BlockSpec((N, p), lambda: (0, 0)),
        scratch_shapes=[pltpu.VMEM((N, 2 * p), jnp.float32)],  # [h | h_neigh] staging
    )(*args)
    return out[:, :f_out_final]


def init_graphsage_params(key, layers):
    """Deterministic Xavier-uniform-ish init matching nn.Linear shapes.

    For each layer i: fc_self.weight (Fout, Fin), fc_neigh.weight (Fout, Fin),
    fc_self.bias (Fout,), fc_neigh.bias (Fout,).  We store weights transposed
    as (Fin, Fout) and the two biases summed as (1, Fout).
    """
    params = []
    for i in range(len(layers) - 1):
        f_in, f_out = layers[i], layers[i + 1]
        key, k1, k2, k3, k4 = jax.random.split(key, 5)
        limit = (6.0 / (f_in + f_out)) ** 0.5
        w_self = jax.random.uniform(k1, (f_in, f_out), jnp.float32, -limit, limit)
        w_neigh = jax.random.uniform(k2, (f_in, f_out), jnp.float32, -limit, limit)
        b_lim = 1.0 / (f_in ** 0.5)
        b_self = jax.random.uniform(k3, (f_out,), jnp.float32, -b_lim, b_lim)
        b_neigh = jax.random.uniform(k4, (f_out,), jnp.float32, -b_lim, b_lim)
        params.append((w_self, w_neigh, (b_self + b_neigh)[None, :]))
    return params


def graphsage_reference(adj, in_feat, params):
    """Pure-JAX reference (DGL mean-aggregator semantics) for correctness checking."""
    h = in_feat
    for (w_self, w_neigh, bias) in params:
        deg = jnp.sum(adj, axis=-1, keepdims=True)
        h_neigh = jnp.where(deg > 0.0, (adj @ h) / jnp.maximum(deg, 1.0), 0.0)
        h = jnp.maximum(h @ w_self + h_neigh @ w_neigh + bias, 0.0)
    return h


if __name__ == "__main__":
    key = jax.random.PRNGKey(0)
    k_graph, k_feat, k_param = jax.random.split(key, 3)

    N = 128                      # number of graph nodes
    layers = [32, 64, 16]        # 2-layer GraphSAGE: 32 -> 64 -> 16

    # Deterministic random graph (dense adjacency, in-edges on rows) + self loops.
    # Unweighted (0/1) adjacency: required for the bf16 cast to be exact.
    adj = (jax.random.uniform(k_graph, (N, N)) < 0.05).astype(jnp.float32)
    adj = jnp.maximum(adj, jnp.eye(N, dtype=jnp.float32))

    in_feat = jax.random.normal(k_feat, (N, layers[0]), jnp.float32)
    params = init_graphsage_params(k_param, layers)

    forward = jax.jit(graphsage_forward)
    out = forward(adj, in_feat, params)
    out = jax.block_until_ready(out)

    ref = graphsage_reference(adj, in_feat, params)
    assert out.shape == (N, layers[-1])
    assert jnp.allclose(out, ref, atol=1e-4, rtol=1e-4), float(jnp.max(jnp.abs(out - ref)))

    print("KERNEL_OK")
</pallas_src>

<mosaic_0001>
module attributes {stable_mosaic.version = 11 : i64} {
  func.func @kernel(%arg0: memref<128x128xbf16, #tpu.memory_space<vmem>>, %arg1: memref<128x128xf32, #tpu.memory_space<vmem>>, %arg2: memref<256x128xf32, #tpu.memory_space<vmem>>, %arg3: memref<256x128xf32, #tpu.memory_space<vmem>>, %arg4: memref<1x128xf32, #tpu.memory_space<vmem>>, %arg5: memref<1x128xf32, #tpu.memory_space<vmem>>, %arg6: memref<128x128xf32, #tpu.memory_space<vmem>>, %arg7: memref<128x256xf32, #tpu.memory_space<vmem>>) attributes {dimension_semantics = [], scalar_prefetch = 0 : i64, scratch_operands = 1 : i64, tpu.core_type = #tpu.core_type<tc>} {
    %c0 = arith.constant 0 : index
    %c0_0 = arith.constant 0 : index
    %0 = vector.load %arg0[%c0, %c0_0] : memref<128x128xbf16, #tpu.memory_space<vmem>>, vector<128x128xbf16>
    %1 = arith.extf %0 : vector<128x128xbf16> to vector<128x128xf32>
    %cst = arith.constant dense<0.000000e+00> : vector<128xf32>
    %2 = vector.multi_reduction <add>, %1, %cst [1] : vector<128x128xf32> to vector<128xf32>
    %3 = vector.shape_cast %2 : vector<128xf32> to vector<128x1xf32>
    %cst_1 = arith.constant 1.000000e+00 : f32
    %4 = vector.broadcast %cst_1 : f32 to vector<128x1xf32>
    %5 = arith.maximumf %3, %4 : vector<128x1xf32>
    %6 = tpu.reciprocal %5 : vector<128x1xf32> -> vector<128x1xf32>
    %c0_2 = arith.constant 0 : index
    %c0_3 = arith.constant 0 : index
    %7 = vector.load %arg1[%c0_2, %c0_3] : memref<128x128xf32, #tpu.memory_space<vmem>>, vector<128x128xf32>
    %c0_4 = arith.constant 0 : index
    %c0_5 = arith.constant 0 : index
    %8 = vector.load %arg7[%c0_4, %c0_5] : memref<128x256xf32, #tpu.memory_space<vmem>>, vector<128x128xf32>
    tpu.vector_store %arg7[%c0_4, %c0_5], %7 {strides = array<i32>} : memref<128x256xf32, #tpu.memory_space<vmem>>, vector<128x128xf32>,
    %cst_6 = arith.constant dense<0.000000e+00> : vector<128x128xf32>
    %9 = tpu.matmul %0, %7, %cst_6 {dimension_numbers = #tpu.dot_dimension_numbers<[1], [0], [0], [1], [0, 0, 1, 1], [], []>} : vector<128x128xbf16>, vector<128x128xf32>, vector<128x128xf32> -> vector<128x128xf32>
    %10 = vector.broadcast %6 : vector<128x1xf32> to vector<128x128xf32>
    %11 = arith.mulf %10, %9 : vector<128x128xf32>
    %c0_7 = arith.constant 0 : index
    %c128 = arith.constant 128 : index
    %12 = vector.load %arg7[%c0_7, %c128] : memref<128x256xf32, #tpu.memory_space<vmem>>, vector<128x128xf32>
    tpu.vector_store %arg7[%c0_7, %c128], %11 {strides = array<i32>} : memref<128x256xf32, #tpu.memory_space<vmem>>, vector<128x128xf32>,
    %c0_8 = arith.constant 0 : index
    %c0_9 = arith.constant 0 : index
    %13 = vector.load %arg7[%c0_8, %c0_9] : memref<128x256xf32, #tpu.memory_space<vmem>>, vector<128x256xf32>
    %c0_10 = arith.constant 0 : index
    %c0_11 = arith.constant 0 : index
    %14 = vector.load %arg2[%c0_10, %c0_11] : memref<256x128xf32, #tpu.memory_space<vmem>>, vector<256x128xf32>
    %cst_12 = arith.constant dense<0.000000e+00> : vector<128x128xf32>
    %15 = tpu.matmul %13, %14, %cst_12 {dimension_numbers = #tpu.dot_dimension_numbers<[1], [0], [0], [1], [0, 0, 1, 1], [], []>} : vector<128x256xf32>, vector<256x128xf32>, vector<128x128xf32> -> vector<128x128xf32>
    %c0_13 = arith.constant 0 : index
    %c0_14 = arith.constant 0 : index
    %16 = vector.load %arg4[%c0_13, %c0_14] : memref<1x128xf32, #tpu.memory_space<vmem>>, vector<1x128xf32>
    %17 = vector.broadcast %16 : vector<1x128xf32> to vector<128x128xf32>
    %18 = arith.addf %15, %17 : vector<128x128xf32>
    %cst_15 = arith.constant 0.000000e+00 : f32
    %19 = vector.broadcast %cst_15 : f32 to vector<128x128xf32>
    %20 = arith.maximumf %18, %19 : vector<128x128xf32>
    %c0_16 = arith.constant 0 : index
    %c0_17 = arith.constant 0 : index
    %21 = vector.load %arg7[%c0_16, %c0_17] : memref<128x256xf32, #tpu.memory_space<vmem>>, vector<128x128xf32>
    tpu.vector_store %arg7[%c0_16, %c0_17], %20 {strides = array<i32>} : memref<128x256xf32, #tpu.memory_space<vmem>>, vector<128x128xf32>,
    %cst_18 = arith.constant dense<0.000000e+00> : vector<128x128xf32>
    %22 = tpu.matmul %0, %20, %cst_18 {dimension_numbers = #tpu.dot_dimension_numbers<[1], [0], [0], [1], [0, 0, 1, 1], [], []>} : vector<128x128xbf16>, vector<128x128xf32>, vector<128x128xf32> -> vector<128x128xf32>
    %23 = vector.broadcast %6 : vector<128x1xf32> to vector<128x128xf32>
    %24 = arith.mulf %23, %22 : vector<128x128xf32>
    %c0_19 = arith.constant 0 : index
    %c128_20 = arith.constant 128 : index
    %25 = vector.load %arg7[%c0_19, %c128_20] : memref<128x256xf32, #tpu.memory_space<vmem>>, vector<128x128xf32>
    tpu.vector_store %arg7[%c0_19, %c128_20], %24 {strides = array<i32>} : memref<128x256xf32, #tpu.memory_space<vmem>>, vector<128x128xf32>,
    %c0_21 = arith.constant 0 : index
    %c0_22 = arith.constant 0 : index
    %26 = vector.load %arg7[%c0_21, %c0_22] : memref<128x256xf32, #tpu.memory_space<vmem>>, vector<128x256xf32>
    %c0_23 = arith.constant 0 : index
    %c0_24 = arith.constant 0 : index
    %27 = vector.load %arg3[%c0_23, %c0_24] : memref<256x128xf32, #tpu.memory_space<vmem>>, vector<256x128xf32>
    %cst_25 = arith.constant dense<0.000000e+00> : vector<128x128xf32>
    %28 = tpu.matmul %26, %27, %cst_25 {dimension_numbers = #tpu.dot_dimension_numbers<[1], [0], [0], [1], [0, 0, 1, 1], [], []>} : vector<128x256xf32>, vector<256x128xf32>, vector<128x128xf32> -> vector<128x128xf32>
    %c0_26 = arith.constant 0 : index
    %c0_27 = arith.constant 0 : index
    %29 = vector.load %arg5[%c0_26, %c0_27] : memref<1x128xf32, #tpu.memory_space<vmem>>, vector<1x128xf32>
    %30 = vector.broadcast %29 : vector<1x128xf32> to vector<128x128xf32>
    %31 = arith.addf %28, %30 : vector<128x128xf32>
    %cst_28 = arith.constant 0.000000e+00 : f32
    %32 = vector.broadcast %cst_28 : f32 to vector<128x128xf32>
    %33 = arith.maximumf %31, %32 : vector<128x128xf32>
    %c0_29 = arith.constant 0 : index
    %c0_30 = arith.constant 0 : index
    %34 = vector.load %arg6[%c0_29, %c0_30] : memref<128x128xf32, #tpu.memory_space<vmem>>, vector<128x128xf32>
    tpu.vector_store %arg6[%c0_29, %c0_30], %33 {strides = array<i32>} : memref<128x128xf32, #tpu.memory_space<vmem>>, vector<128x128xf32>,
    return
  }
}

</mosaic_0001>

<bundles_post_ra>
// kernel: graphsage_forward.1
= control target key start
LH: loop header
LB: loop body
LE: loop exit
PB: predicated region body
PF: predicated region fallthrough
CT: control target
= control target key end

     0   :  { %s2036_s1 = inlined_call_operand.vmem [shape: f32[128,128], index: 1, kind: input, shape index: {}]   ;;  %s2037_s0 = inlined_call_operand.vmem [shape: bf16[128,128], index: 0, kind: input, shape index: {}]   ;;  %s2038_s2 = inlined_call_operand.vmem [shape: f32[256,128], index: 2, kind: input, shape index: {}]   ;;  %s2039_s4 = inlined_call_operand.vmem [shape: f32[1,128], index: 4, kind: input, shape index: {}]   ;;  %s2040_s3 = inlined_call_operand.vmem [shape: f32[256,128], index: 3, kind: input, shape index: {}]   ;;  %s2041_s5 = inlined_call_operand.vmem [shape: f32[1,128], index: 5, kind: input, shape index: {}]   ;;  %s2042_s6 = inlined_call_operand.vmem [shape: f32[128,128], index: 6, kind: output, shape index: {}]  }
   0x1   :  { %v1422_v0 = vld [vmem:[%s2036_s1 + $0x78] sm:$0xff]  ;;  %v1427_v1 = vld [vmem:[%s2036_s1 + $0x70] sm:$0xff]  ;;  %v1434_v2 = vld [vmem:[%s2036_s1 + $0x68] sm:$0xff] }
   0x2   :  { %1240 = vmatprep.subr.mxu1 %v1422_v0  ;;  %v1441_v3 = vld [vmem:[%s2036_s1 + $0x60] sm:$0xff]  ;;  %v1450_v5 = vld [vmem:[%s2037_s0 + $0x8] sm:$0xff]   ;;  %v1456_v6 = vld [vmem:[%s2036_s1 + $0x58] sm:$0xff] }
   0x3   :  { %1241 = vmatpush3.msra.mxu1 %v1422_v0  ;;  %v24_v4 = vld [vmem:[%s2037_s0] sm:$0xff]   ;;  %v42_v7 = vunpack.c.l.bf16 %v1450_v5  ;;  %v1464_v9 = vld [vmem:[%s2036_s1 + $0x50] sm:$0xff]  ;;  %v43_v10 = vunpack.c.h.bf16 %v1450_v5  ;;  %v1472_v11 = vld [vmem:[%s2036_s1 + $0x48] sm:$0xff] }
   0x4   :  { %1242 = vmatprep.subr.mxu1 %v1427_v1  ;;  %v40_v8 = vunpack.c.l.bf16 %v24_v4  ;;  %1272 = vmatprep.mubr.bf16.mxu1 %v24_v4  ;;  %v41_v12 = vunpack.c.h.bf16 %v24_v4  ;;  %v1479_v13 = vld [vmem:[%s2036_s1 + $0x40] sm:$0xff]  ;;  %v1484_v14 = vld [vmem:[%s2037_s0 + $0x10] sm:$0xff]   ;;  %v1492_v16 = vld [vmem:[%s2036_s1 + $0x38] sm:$0xff] }
   0x5   :  { %1243 = vmatpush3.msra.mxu1 %v1427_v1  ;;  %60 = vadd.xlane.f32.xlu1 %v42_v7  ;;  %v45_v15 = vunpack.c.h.bf16 %v1484_v14  ;;  %v44_v17 = vunpack.c.l.bf16 %v1484_v14  ;;  %v1500_v18 = vld [vmem:[%s2036_s1 + $0x30] sm:$0xff]  ;;  %v1505_v19 = vld [vmem:[%s2037_s0 + $0x18] sm:$0xff]   ;;  %v1513_v21 = vld [vmem:[%s2036_s1 + $0x28] sm:$0xff] }
   0x6   :  { %1244 = vmatprep.subr.mxu1 %v1434_v2  ;;  %56 = vadd.xlane.f32.xlu0 %v40_v8  ;;  %v47_v20 = vunpack.c.h.bf16 %v1505_v19  ;;  %v46_v22 = vunpack.c.l.bf16 %v1505_v19  ;;  %v1521_v23 = vld [vmem:[%s2036_s1 + $0x20] sm:$0xff]  ;;  %v1534_v26 = vld [vmem:[%s2036_s1 + $0x18] sm:$0xff]  ;;  %v1542_v28 = vld [vmem:[%s2036_s1 + $0x10] sm:$0xff] }
   0x7   :  { %1245 = vmatpush3.msra.mxu1 %v1434_v2  ;;  %1320 = vmatprep.mubr.bf16.mxu0 %v24_v4  ;;  %v1526_v24 = vld [vmem:[%s2037_s0 + $0x20] sm:$0xff]   ;;  %v1547_v29 = vld [vmem:[%s2037_s0 + $0x28] sm:$0xff]   ;;  %v1568_v34 = vld [vmem:[%s2037_s0 + $0x30] sm:$0xff]  }
   0x8   :  { %1246 = vmatprep.subr.mxu1 %v1441_v3  ;;  %v49_v25 = vunpack.c.h.bf16 %v1526_v24  ;;  %v48_v27 = vunpack.c.l.bf16 %v1526_v24  ;;  %v51_v30 = vunpack.c.h.bf16 %v1547_v29  ;;  %v1555_v31 = vld [vmem:[%s2036_s1 + $0x8] sm:$0xff]  ;;  %v50_v32 = vunpack.c.l.bf16 %v1547_v29  ;;  %v1563_v33 = vld [vmem:[%s2036_s1] sm:$0xff]  ;;  %v1579_v37 = vld [vmem:[%s2037_s0 + $0x38] sm:$0xff]  }
   0x9   :  { %1247 = vmatpush3.msra.mxu1 %v1441_v3  ;;  %62 = vadd.xlane.f32.xlu1 %v43_v10  ;;  %v53_v35 = vunpack.c.h.bf16 %v1568_v34  ;;  %v52_v36 = vunpack.c.l.bf16 %v1568_v34  ;;  %v424_v38 = vld [vmem:[%s2038_s2 + $0xf8] sm:$0xff]  ;;  %v55_v39 = vunpack.c.h.bf16 %v1579_v37  ;;  %v54_v41 = vunpack.c.l.bf16 %v1579_v37  ;;  %v423_v42 = vld [vmem:[%s2038_s2 + $0xf0] sm:$0xff]  ;;  %v422_v44 = vld [vmem:[%s2038_s2 + $0xe8] sm:$0xff] }
   0xa   :  { %1248 = vmatprep.subr.mxu1 %v1456_v6  ;;  %58 = vadd.xlane.f32.xlu0 %v41_v12  ;;  %v408_v40 = vld [vmem:[%s2038_s2 + $0x78] sm:$0xff]  ;;  %v407_v43 = vld [vmem:[%s2038_s2 + $0x70] sm:$0xff]  ;;  %v406_v45 = vld [vmem:[%s2038_s2 + $0x68] sm:$0xff] }
   0xb   :  { %1249 = vmatpush3.msra.mxu1 %v1456_v6  ;;  %v421_v46 = vld [vmem:[%s2038_s2 + $0xe0] sm:$0xff]  ;;  %v420_v48 = vld [vmem:[%s2038_s2 + $0xd8] sm:$0xff]  ;;  %v419_v50 = vld [vmem:[%s2038_s2 + $0xd0] sm:$0xff] }
   0xc   :  { %1250 = vmatprep.subr.mxu1 %v1464_v9  ;;  %v405_v47 = vld [vmem:[%s2038_s2 + $0x60] sm:$0xff]  ;;  %v404_v49 = vld [vmem:[%s2038_s2 + $0x58] sm:$0xff]  ;;  %v403_v51 = vld [vmem:[%s2038_s2 + $0x50] sm:$0xff] }
   0xd   :  { %1251 = vmatpush3.msra.mxu1 %v1464_v9  ;;  %66 = vadd.xlane.f32.xlu1 %v45_v15  ;;  %v418_v52 = vld [vmem:[%s2038_s2 + $0xc8] sm:$0xff]  ;;  %v417_v54 = vld [vmem:[%s2038_s2 + $0xc0] sm:$0xff]  ;;  %v416_v56 = vld [vmem:[%s2038_s2 + $0xb8] sm:$0xff] }
   0xe   :  { %1252 = vmatprep.subr.mxu1 %v1472_v11  ;;  %64 = vadd.xlane.f32.xlu0 %v44_v17  ;;  %v402_v53 = vld [vmem:[%s2038_s2 + $0x48] sm:$0xff]  ;;  %v401_v55 = vld [vmem:[%s2038_s2 + $0x40] sm:$0xff]  ;;  %v400_v57 = vld [vmem:[%s2038_s2 + $0x38] sm:$0xff] }
   0xf   :  { %1253 = vmatpush3.msra.mxu1 %v1472_v11  ;;  %v415_v58 = vld [vmem:[%s2038_s2 + $0xb0] sm:$0xff]  ;;  %v414_v60 = vld [vmem:[%s2038_s2 + $0xa8] sm:$0xff]  ;;  %v413_v62 = vld [vmem:[%s2038_s2 + $0xa0] sm:$0xff] }
  0x10   :  { %1254 = vmatprep.subr.mxu1 %v1479_v13  ;;  %v399_v59 = vld [vmem:[%s2038_s2 + $0x30] sm:$0xff]  ;;  %v398_v61 = vld [vmem:[%s2038_s2 + $0x28] sm:$0xff]  ;;  %v397_v63 = vld [vmem:[%s2038_s2 + $0x20] sm:$0xff] }
  0x11   :  { %1255 = vmatpush3.msra.mxu1 %v1479_v13  ;;  %70 = vadd.xlane.f32.xlu1 %v47_v20  ;;  %v412_v4 = vld [vmem:[%s2038_s2 + $0x98] sm:$0xff]  ;;  %v411_v8 = vld [vmem:[%s2038_s2 + $0x90] sm:$0xff]  ;;  %v410_v12 = vld [vmem:[%s2038_s2 + $0x88] sm:$0xff] }
  0x12   :  { %1256 = vmatprep.subr.mxu1 %v1492_v16  ;;  %68 = vadd.xlane.f32.xlu0 %v46_v22  ;;  %v396_v7 = vld [vmem:[%s2038_s2 + $0x18] sm:$0xff]  ;;  %v395_v10 = vld [vmem:[%s2038_s2 + $0x10] sm:$0xff]  ;;  %v394_v15 = vld [vmem:[%s2038_s2 + $0x8] sm:$0xff] }
  0x13   :  { %1257 = vmatpush3.msra.mxu1 %v1492_v16  ;;  %v409_v17 = vld [vmem:[%s2038_s2 + $0x80] sm:$0xff] }
  0x14   :  { %1258 = vmatprep.subr.mxu1 %v1500_v18  ;;  %v393_v20 = vld [vmem:[%s2038_s2] sm:$0xff] }
  0x15   :  { %1259 = vmatpush3.msra.mxu1 %v1500_v18  ;;  %74 = vadd.xlane.f32.xlu1 %v49_v25 }
  0x16   :  { %1260 = vmatprep.subr.mxu1 %v1513_v21  ;;  %72 = vadd.xlane.f32.xlu0 %v48_v27 }
  0x17   :  { %1261 = vmatpush3.msra.mxu1 %v1513_v21 }
  0x18   :  { %1262 = vmatprep.subr.mxu1 %v1521_v23 }
  0x19   :  { %1263 = vmatpush3.msra.mxu1 %v1521_v23  ;;  %78 = vadd.xlane.f32.xlu1 %v51_v30 }
  0x1a   :  { %1264 = vmatprep.subr.mxu1 %v1534_v26  ;;  %76 = vadd.xlane.f32.xlu0 %v50_v32 }
  0x1b   :  { %1265 = vmatpush3.msra.mxu1 %v1534_v26 }
  0x1c   :  { %1266 = vmatprep.subr.mxu1 %v1542_v28 }
  0x1d   :  { %1267 = vmatpush3.msra.mxu1 %v1542_v28  ;;  %82 = vadd.xlane.f32.xlu1 %v53_v35 }
  0x1e   :  { %1268 = vmatprep.subr.mxu1 %v1555_v31  ;;  %80 = vadd.xlane.f32.xlu0 %v52_v36 }
  0x1f   :  { %1269 = vmatpush3.msra.mxu1 %v1555_v31 }
  0x20   :  { %1270 = vmatprep.subr.mxu1 %v1563_v33 }
  0x21   :  { %1271 = vmatpush3.msra.mxu1 %v1563_v33  ;;  %86 = vadd.xlane.f32.xlu1 %v55_v39 }
  0x22   :  { %1273 = vmatmul.mubr.bf16.vlgmr.msra.gmra.mxu1 %v1450_v5  ;;  %1056 = vmatprep.subr.mxu1 %v424_v38 }
  0x23   :  { %1276 = vmatprep.mubr.bf16.mxu1 %v1484_v14  ;;  %1057 = vmatpush3.msra.mxu1 %v408_v40 }
  0x24   :  { %1058 = vmatprep.subr.mxu1 %v423_v42  ;;  %84 = vadd.xlane.f32.xlu0 %v54_v41 }
  0x25   :  { %1059 = vmatpush3.msra.mxu1 %v407_v43 }
  0x26   :  { %1060 = vmatprep.subr.mxu1 %v422_v44 }
  0x27   :  { %1061 = vmatpush3.msra.mxu1 %v406_v45 }
  0x28   :  { %1062 = vmatprep.subr.mxu1 %v421_v46 }
  0x29   :  { %1063 = vmatpush3.msra.mxu1 %v405_v47 }
  0x2a   :  { %1277 = vmatmul.mubr.bf16.gmra.mxu1 %v1505_v19  ;;  %1064 = vmatprep.subr.mxu1 %v420_v48 }
  0x2b   :  { %1280 = vmatprep.mubr.bf16.mxu1 %v1526_v24  ;;  %1065 = vmatpush3.msra.mxu1 %v404_v49 }
  0x2c   :  { %1066 = vmatprep.subr.mxu1 %v419_v50 }
  0x2d   :  { %1067 = vmatpush3.msra.mxu1 %v403_v51 }
  0x2e   :  { %1068 = vmatprep.subr.mxu1 %v418_v52 }
  0x2f   :  { %1069 = vmatpush3.msra.mxu1 %v402_v53 }
  0x30   :  { %1070 = vmatprep.subr.mxu1 %v417_v54 }
  0x31   :  { %1071 = vmatpush3.msra.mxu1 %v401_v55 }
  0x32   :  { %1281 = vmatmul.mubr.bf16.gmra.mxu1 %v1547_v29  ;;  %1072 = vmatprep.subr.mxu1 %v416_v56 }
  0x33   :  { %1284 = vmatprep.mubr.bf16.mxu1 %v1568_v34  ;;  %1073 = vmatpush3.msra.mxu1 %v400_v57 }
  0x34   :  { %1074 = vmatprep.subr.mxu1 %v415_v58 }
  0x35   :  { %1075 = vmatpush3.msra.mxu1 %v399_v59 }
  0x36   :  { %1076 = vmatprep.subr.mxu1 %v414_v60 }
  0x37   :  { %1077 = vmatpush3.msra.mxu1 %v398_v61 }
  0x38   :  { %1078 = vmatprep.subr.mxu1 %v413_v62 }
  0x39   :  { %1079 = vmatpush3.msra.mxu1 %v397_v63 }
  0x3a   :  { %1285 = vmatmul.mubr.bf16.gmra.mxu1 %v1579_v37  ;;  %1080 = vmatprep.subr.mxu1 %v412_v4 }
  0x3b   :  { %1081 = vmatpush3.msra.mxu1 %v396_v7 }
  0x3c   :  { %1082 = vmatprep.subr.mxu1 %v411_v8 }
  0x3d   :  { %1083 = vmatpush3.msra.mxu1 %v395_v10 }
  0x3e   :  { %1084 = vmatprep.subr.mxu1 %v410_v12 }
  0x3f   :  { %1085 = vmatpush3.msra.mxu1 %v394_v15 }
  0x40   :  { %1086 = vmatprep.subr.mxu1 %v409_v17 }
  0x41   :  { %1087 = vmatpush3.msra.mxu1 %v393_v20 }
  0x8e   :  { %v61_v27 = vpop.xlane.xlu1 %60 }
  0x8f   :  { %v57_v22 = vpop.xlane.xlu0 %56  ;;  %v90_v35 = vmax.f32 %v61_v27, 1.0 }
  0x90   :  { %v88_v25 = vmax.f32 %v57_v22, 1.0 }
  0x92   :  { %1352 = vrcp.f32 %v88_v25  ;;  %v63_v36 = vpop.xlane.xlu1 %62 }
  0x93   :  { %v59_v30 = vpop.xlane.xlu0 %58  ;;  %v91_v38 = vmax.f32 %v63_v36, 1.0 }
  0x94   :  { %v89_v32 = vmax.f32 %v59_v30, 1.0 }
  0x96   :  { %1354 = vrcp.f32 %v89_v32  ;;  %v67_v42 = vpop.xlane.xlu1 %66 }
  0x97   :  { %1356 = vrcp.f32 %v90_v35  ;;  %v65_v39 = vpop.xlane.xlu0 %64  ;;  %v93_v44 = vmax.f32 %v67_v42, 1.0 }
  0x98   :  { %v92_v40 = vmax.f32 %v65_v39, 1.0  ;;  %1358 = vrcp.f32 %v91_v38 }
  0x9a   :  { %1360 = vrcp.f32 %v92_v40  ;;  %v71_v52 = vpop.xlane.xlu1 %70 }
  0x9b   :  { %v69_v45 = vpop.xlane.xlu0 %68  ;;  %1362 = vrcp.f32 %v93_v44  ;;  %v95_v56 = vmax.f32 %v71_v52, 1.0 }
  0x9c   :  { %v94_v50 = vmax.f32 %v69_v45, 1.0 }
  0x9e   :  { %1364 = vrcp.f32 %v94_v50  ;;  %v75_v7 = vpop.xlane.xlu1 %74 }
  0x9f   :  { %v1686_v41 = vpop.eup %1352  ;;  %v73_v60 = vpop.xlane.xlu0 %72  ;;  %1366 = vrcp.f32 %v95_v56  ;;  %v97_v8 = vmax.f32 %v75_v7, 1.0 }
  0xa0   :  { %v96_v61 = vmax.f32 %v73_v60, 1.0 }
  0xa2   :  { %1368 = vrcp.f32 %v96_v61 }
  0xa3   :  { %v1689_v48 = vpop.eup %1354  ;;  %v77_v12 = vpop.xlane.xlu0 %76  ;;  %1370 = vrcp.f32 %v97_v8 }
  0xa4   :  { %v1691_v51 = vpop.eup %1356  ;;  %v98_v17 = vmax.f32 %v77_v12, 1.0 }
  0xa5   :  { %v1696_v58 = vpop.eup %1358 }
  0xa6   :  { %1372 = vrcp.f32 %v98_v17 }
  0xa7   :  { %v1699_v62 = vpop.eup %1360  ;;  %v81_v32 = vpop.xlane.xlu0 %80 }
  0xa8   :  { %v1704_v10 = vpop.eup %1362  ;;  %v100_v35 = vmax.f32 %v81_v32, 1.0 }
  0xab   :  { %v1708_v20 = vpop.eup %1364 }
  0xac   :  { %v1712_v30 = vpop.eup %1366 }
  0xad   :  { %v85_v44 = vpop.xlane.xlu0 %84 }
  0xaf   :  { %v1715_v36 = vpop.eup %1368 }
  0xe2   :  { %v1274_v43 = vpop.f32.mrf.mxu1 }
  0xe3   :  { %v331_v57 = vmul.f32 %v1691_v51, %v1274_v43  ;;  %v1720_v43 = vpop.eup %1370 }
  0xe4   :  { %v266_v46 = vpop.f32.mrf.mxu1 }
  0xe5   :  { %v329_v47 = vmul.f32 %v1686_v41, %v266_v46  ;;  %v102_v46 = vmax.f32 %v85_v44, 1.0 }
  0xe6   :  { %v1275_v49 = vpop.f32.mrf.mxu1 }
  0xe7   :  { %496 = vmatprep.mubr.f32.mxu1 %v329_v47  ;;  %v1724_v47 = vpop.eup %1372 }
  0xe8   :  { %v269_v53 = vpop.f32.mrf.mxu1  ;;  %497 = vmatmul.mubr.f32.vlgmr.msra.gmra.mxu1 %v1563_v33  ;;  %v332_v33 = vmul.f32 %v1696_v58, %v1275_v49 }
  0xe9   :  { %v330_v54 = vmul.f32 %v1689_v48, %v269_v53 }
  0xea   :  { %v1278_v55 = vpop.f32.mrf.mxu1 }
  0xeb   :  { %501 = vmatprep.mubr.f32.mxu1 %v330_v54  ;;  %v335_v25 = vmul.f32 %v1708_v20, %v1278_v55 }
  0xec   :  { %502 = vmatmul.mubr.f32.gmra.mxu1 %v1555_v31  ;;  %v282_v59 = vpop.f32.mrf.mxu1 }
  0xed   :  { %506 = vmatprep.mubr.f32.mxu1 %v331_v57  ;;  %v333_v4 = vmul.f32 %v1699_v62, %v282_v59 }
  0xee   :  { %v1279_v63 = vpop.f32.mrf.mxu1 }
  0xef   :  { %v336_v38 = vmul.f32 %v1712_v30, %v1279_v63 }
  0xf0   :  { %507 = vmatmul.mubr.f32.gmra.mxu1 %v1542_v28  ;;  %v285_v31 = vpop.f32.mrf.mxu1  ;;  %v79_v28 = vpop.xlane.xlu1 %78 }
  0xf1   :  { %511 = vmatprep.mubr.f32.mxu1 %v332_v33  ;;  %v334_v15 = vmul.f32 %v1704_v10, %v285_v31  ;;  %v99_v27 = vmax.f32 %v79_v28, 1.0 }
  0xf2   :  { %v1282_v22 = vpop.f32.mrf.mxu1 }
  0xf3   :  { %1374 = vrcp.f32 %v99_v27  ;;  %v339_v50 = vmul.f32 %v1724_v47, %v1282_v22 }
  0xf4   :  { %512 = vmatmul.mubr.f32.gmra.mxu1 %v1534_v26  ;;  %v298_v26 = vpop.f32.mrf.mxu1  ;;  %1376 = vrcp.f32 %v100_v35  ;;  %v83_v40 = vpop.xlane.xlu1 %82 }
  0xf5   :  { %516 = vmatprep.mubr.f32.mxu1 %v333_v4  ;;  %v337_v39 = vmul.f32 %v1715_v36, %v298_v26  ;;  %v101_v42 = vmax.f32 %v83_v40, 1.0 }
  0xf7   :  { %1378 = vrcp.f32 %v101_v42 }
  0xf8   :  { %517 = vmatmul.mubr.f32.gmra.mxu1 %v1521_v23  ;;  %v1283_v23 = vpop.f32.mrf.mxu1  ;;  %1380 = vrcp.f32 %v102_v46 }
  0xf9   :  { %521 = vmatprep.mubr.f32.mxu1 %v334_v15 }
  0xfc   :  { %522 = vmatmul.mubr.f32.gmra.mxu1 %v1513_v21  ;;  %v301_v21 = vpop.f32.mrf.mxu1 }
  0xfd   :  { %526 = vmatprep.mubr.f32.mxu1 %v335_v25  ;;  %v338_v45 = vmul.f32 %v1720_v43, %v301_v21 }
  0xfe   :  { %v1286_v49 = vpop.f32.mrf.mxu1 }
 0x100   :  { %527 = vmatmul.mubr.f32.gmra.mxu1 %v1500_v18  ;;  %v87_v18 = vpop.xlane.xlu1 %86  ;;  %v1728_v53 = vpop.eup %1374 }
 0x101   :  { %531 = vmatprep.mubr.f32.mxu1 %v336_v38  ;;  %v103_v52 = vmax.f32 %v87_v18, 1.0  ;;  %v1731_v54 = vpop.eup %1376  ;;  %v340_v55 = vmul.f32 %v1728_v53, %v1283_v23 }
 0x103   :  { %1382 = vrcp.f32 %v103_v52 }
 0x104   :  { %532 = vmatmul.mubr.f32.gmra.mxu1 %v1492_v16  ;;  %v314_v16 = vpop.f32.mrf.mxu1  ;;  %v1736_v57 = vpop.eup %1378 }
 0x105   :  { %536 = vmatprep.mubr.f32.mxu1 %v337_v39  ;;  %v1740_v60 = vpop.eup %1380 }
 0x106   :  { %v1287_v56 = vpop.f32.mrf.mxu1  ;;  %v343_v61 = vmul.f32 %v1740_v60, %v1286_v49 }
 0x108   :  { %537 = vmatmul.mubr.f32.gmra.mxu1 %v1479_v13  ;;  %v341_v13 = vmul.f32 %v1731_v54, %v314_v16  ;;  %v317_v59 = vpop.f32.mrf.mxu1 }
 0x109   :  { %541 = vmatprep.mubr.f32.mxu1 %v338_v45 }
 0x10c   :  { %542 = vmatmul.mubr.f32.gmra.mxu1 %v1472_v11  ;;  %v342_v11 = vmul.f32 %v1736_v57, %v317_v59 }
 0x10d   :  { %546 = vmatprep.mubr.f32.mxu1 %v339_v50 }
 0x110   :  { %547 = vmatmul.mubr.f32.gmra.mxu1 %v1464_v9  ;;  %v1744_v33 = vpop.eup %1382 }
 0x111   :  { %551 = vmatprep.mubr.f32.mxu1 %v340_v55  ;;  %v344_v9 = vmul.f32 %v1744_v33, %v1287_v56 }
 0x114   :  { %552 = vmatmul.mubr.f32.gmra.mxu1 %v1456_v6 }
 0x115   :  { %556 = vmatprep.mubr.f32.mxu1 %v341_v13 }
 0x118   :  { %557 = vmatmul.mubr.f32.gmra.mxu1 %v1441_v3 }
 0x119   :  { %561 = vmatprep.mubr.f32.mxu1 %v342_v11 }
 0x11c   :  { %562 = vmatmul.mubr.f32.gmra.mxu1 %v1434_v2 }
 0x11d   :  { %566 = vmatprep.mubr.f32.mxu1 %v343_v61 }
 0x120   :  { %567 = vmatmul.mubr.f32.gmra.mxu1 %v1427_v1 }
 0x121   :  { %571 = vmatprep.mubr.f32.mxu1 %v344_v9  ;;  %v1030_v9 = vld [vmem:[%s2039_s4] ss:$0 sm:$0xff] }
 0x124   :  { %572 = vmatmul.mubr.f32.gmra.mxu1 %v1422_v0 }
 0x1a8   :  { %v1088_v6 = vpop.f32.mrf.mxu1 }
 0x1aa   :  { %v1089_v63 = vpop.f32.mrf.mxu1 }
 0x1ab   :  { %v1750_v4 = vadd.f32 %v1089_v63, %v1088_v6 }
 0x1ac   :  { %v1091_v3 = vpop.f32.mrf.mxu1 }
 0x1ae   :  { %v1092_v7 = vpop.f32.mrf.mxu1 }
 0x1af   :  { %v1752_v8 = vadd.f32 %v1092_v7, %v1091_v3 }
 0x1b0   :  { %v1094_v31 = vpop.f32.mrf.mxu1 }
 0x1b2   :  { %v1095_v12 = vpop.f32.mrf.mxu1 }
 0x1b3   :  { %v1754_v15 = vadd.f32 %v1095_v12, %v1094_v31 }
 0x1b4   :  { %v1097_v2 = vpop.f32.mrf.mxu1 }
 0x1b6   :  { %v1098_v17 = vpop.f32.mrf.mxu1 }
 0x1b7   :  { %v1756_v28 = vadd.f32 %v1098_v17, %v1097_v2 }
 0x1b8   :  { %v1100_v1 = vpop.f32.mrf.mxu1 }
 0x1ba   :  { %v1101_v22 = vpop.f32.mrf.mxu1 }
 0x1bb   :  { %v1758_v25 = vadd.f32 %v1101_v22, %v1100_v1 }
 0x1bc   :  { %v1103_v0 = vpop.f32.mrf.mxu1 }
 0x1be   :  { %v1104_v27 = vpop.f32.mrf.mxu1 }
 0x1c0   :  { %v1106_v26 = vpop.f32.mrf.mxu1 }
 0x1c2   :  { %v1107_v32 = vpop.f32.mrf.mxu1 }
 0x1c4   :  { %v1109_v35 = vpop.f32.mrf.mxu1 }
 0x1c6   :  { %v1110_v38 = vpop.f32.mrf.mxu1 }
 0x1c8   :  { %v1112_v23 = vpop.f32.mrf.mxu1 }
 0x1ca   :  { %v1113_v39 = vpop.f32.mrf.mxu1 }
 0x1cc   :  { %v1115_v40 = vpop.f32.mrf.mxu1 }
 0x1ce   :  { %v1116_v42 = vpop.f32.mrf.mxu1 }
 0x1cf   :  { %v1117_v22 = vadd.f32 %v1116_v42, %v1115_v40  ;;  %v1108_v40 = vadd.f32 %v1107_v32, %v1106_v26 }
 0x1d0   :  { %v1118_v21 = vpop.f32.mrf.mxu1 }
 0x1d2   :  { %v1119_v44 = vpop.f32.mrf.mxu1 }
 0x1d3   :  { %v1120_v2 = vadd.f32 %v1119_v44, %v1118_v21  ;;  %v1111_v21 = vadd.f32 %v1110_v38, %v1109_v35  ;;  %v544_v44 = vadd.f32 %v1117_v22, %v1030_v9  ;;  %v529_v35 = vadd.f32 %v1108_v40, %v1030_v9  ;;  %v828_v22 = vld [vmem:[%s2040_s3 + $0xd0] sm:$0xff] }
 0x1d4   :  { %v1121_v45 = vpop.f32.mrf.mxu1  ;;  %v824_v40 = vld [vmem:[%s2040_s3 + $0xb0] sm:$0xff] }
 0x1d6   :  { %v1122_v46 = vpop.f32.mrf.mxu1 }
 0x1d7   :  { %v1123_v7 = vadd.f32 %v1122_v46, %v1121_v45  ;;  %v1114_v45 = vadd.f32 %v1113_v39, %v1112_v23  ;;  %v549_v46 = vadd.f32 %v1120_v2, %v1030_v9  ;;  %v1105_v23 = vadd.f32 %v1104_v27, %v1103_v0  ;;  %v829_v2 = vld [vmem:[%s2040_s3 + $0xd8] sm:$0xff] }
 0x1d8   :  { %v1124_v18 = vpop.f32.mrf.mxu1  ;;  %v534_v39 = vadd.f32 %v1111_v21, %v1030_v9  ;;  %v519_v0 = vadd.f32 %v1758_v25, %v1030_v9  ;;  %v1798_v27 = vmax.f32 %v529_v35, 0.0  ;;  %v504_v25 = vadd.f32 %v1752_v8, %v1030_v9  ;;  %v825_v21 = vld [vmem:[%s2040_s3 + $0xb8] sm:$0xff] }
 0x1d9   :  { %v539_v42 = vadd.f32 %v1114_v45, %v1030_v9  ;;  %v524_v26 = vadd.f32 %v1105_v23, %v1030_v9  ;;  %v827_v45 = vld [vmem:[%s2040_s3 + $0xc8] sm:$0xff]  ;;  %v821_v35 = vld [vmem:[%s2040_s3 + $0x98] sm:$0xff] }
 0x1da   :  { %v1125_v49 = vpop.f32.mrf.mxu1  ;;  %v1793_v32 = vmax.f32 %v534_v39, 0.0  ;;  %v823_v23 = vld [vmem:[%s2040_s3 + $0xa8] sm:$0xff] }
 0x1db   :  { %v1126_v6 = vadd.f32 %v1125_v49, %v1124_v18  ;;  %v1789_v38 = vmax.f32 %v539_v42, 0.0  ;;  %v808_v42 = vld [vmem:[%s2040_s3 + $0x30] sm:$0xff]  ;;  %v807_v39 = vld [vmem:[%s2040_s3 + $0x28] sm:$0xff] }
 0x1dc   :  { %v1127_v50 = vpop.f32.mrf.mxu1 }
 0x1dd   :  { %v559_v17 = vadd.f32 %v1126_v6, %v1030_v9 }
 0x1de   :  { %v1128_v52 = vpop.f32.mrf.mxu1 }
 0x1df   :  { %v1129_v11 = vadd.f32 %v1128_v52, %v1127_v50  ;;  %v554_v50 = vadd.f32 %v1123_v7, %v1030_v9  ;;  %v1773_v18 = vmax.f32 %v559_v17, 0.0  ;;  %v831_v7 = vld [vmem:[%s2040_s3 + $0xe8] sm:$0xff]  ;;  %v813_v17 = vld [vmem:[%s2040_s3 + $0x58] sm:$0xff] }
 0x1e0   :  { %v1130_v16 = vpop.f32.mrf.mxu1 }
 0x1e1   :  { %v564_v31 = vadd.f32 %v1129_v11, %v1030_v9  ;;  %v1777_v49 = vmax.f32 %v554_v50, 0.0  ;;  %v1808_v11 = vmax.f32 %v519_v0, 0.0  ;;  %v812_v50 = vld [vmem:[%s2040_s3 + $0x50] sm:$0xff] }
 0x1e2   :  { %v1131_v55 = vpop.f32.mrf.mxu1  ;;  %v820_v0 = vld [vmem:[%s2040_s3 + $0x90] sm:$0xff] }
 0x1e3   :  { %v1132_v13 = vadd.f32 %v1131_v55, %v1130_v16  ;;  %v1769_v52 = vmax.f32 %v564_v31, 0.0  ;;  %v1781_v16 = vmax.f32 %v549_v46, 0.0  ;;  %v1785_v55 = vmax.f32 %v544_v44, 0.0  ;;  %v815_v31 = vld [vmem:[%s2040_s3 + $0x68] sm:$0xff]  ;;  %v809_v44 = vld [vmem:[%s2040_s3 + $0x38] sm:$0xff] }
 0x1e4   :  { %v1133_v56 = vpop.f32.mrf.mxu1  ;;  %v811_v46 = vld [vmem:[%s2040_s3 + $0x48] sm:$0xff] }
 0x1e5   :  { %v569_v63 = vadd.f32 %v1132_v13, %v1030_v9  ;;  %v1803_v13 = vmax.f32 %v524_v26, 0.0  ;;  %v805_v26 = vld [vmem:[%s2040_s3 + $0x18] sm:$0xff] }
 0x1e6   :  { %v1134_v59 = vpop.f32.mrf.mxu1 }
 0x1e7   :  { %v1135_v61 = vadd.f32 %v1134_v59, %v1133_v56  ;;  %v1765_v1 = vmax.f32 %v569_v63, 0.0  ;;  %v514_v56 = vadd.f32 %v1756_v28, %v1030_v9  ;;  %v509_v59 = vadd.f32 %v1754_v15, %v1030_v9  ;;  %v832_v63 = vld [vmem:[%s2040_s3 + $0xf0] sm:$0xff] }
 0x1e8   :  { %v499_v28 = vadd.f32 %v1750_v4, %v1030_v9  ;;  %v1822_v15 = vmax.f32 %v504_v25, 0.0  ;;  %v833_v4 = vld [vmem:[%s2040_s3 + $0xf8] sm:$0xff]  ;;  %v803_v25 = vld [vmem:[%s2040_s3 + $0x8] sm:$0xff] }
 0x1e9   :  { %v574_v3 = vadd.f32 %v1135_v61, %v1030_v9  ;;  %v1813_v61 = vmax.f32 %v514_v56, 0.0  ;;  %v1818_v6 = vmax.f32 %v509_v59, 0.0  ;;  %v817_v9 = vld [vmem:[%s2040_s3 + $0x78] sm:$0xff]  ;;  %v804_v56 = vld [vmem:[%s2040_s3 + $0x10] sm:$0xff]  ;;  %v819_v59 = vld [vmem:[%s2040_s3 + $0x88] sm:$0xff] }
 0x1ea   :  { %v1826_v8 = vmax.f32 %v499_v28, 0.0  ;;  %v802_v28 = vld [vmem:[%s2040_s3] sm:$0xff] }
 0x1eb   :  { %v1763_v12 = vmax.f32 %v574_v3, 0.0  ;;  %v816_v3 = vld [vmem:[%s2040_s3 + $0x70] sm:$0xff] }
 0x1ed   :  { %1288 = vmatprep.subr.mxu0 %v1763_v12 }
 0x1ee   :  { %1289 = vmatpush3.msra.mxu0 %v1763_v12 }
 0x1ef   :  { %1290 = vmatprep.subr.mxu0 %v1765_v1 }
 0x1f0   :  { %1291 = vmatpush3.msra.mxu0 %v1765_v1 }
 0x1f1   :  { %1292 = vmatprep.subr.mxu0 %v1769_v52 }
 0x1f2   :  { %1293 = vmatpush3.msra.mxu0 %v1769_v52 }
 0x1f3   :  { %1294 = vmatprep.subr.mxu0 %v1773_v18 }
 0x1f4   :  { %1295 = vmatpush3.msra.mxu0 %v1773_v18 }
 0x1f5   :  { %1296 = vmatprep.subr.mxu0 %v1777_v49 }
 0x1f6   :  { %1297 = vmatpush3.msra.mxu0 %v1777_v49 }
 0x1f7   :  { %1298 = vmatprep.subr.mxu0 %v1781_v16 }
 0x1f8   :  { %1299 = vmatpush3.msra.mxu0 %v1781_v16 }
 0x1f9   :  { %1300 = vmatprep.subr.mxu0 %v1785_v55 }
 0x1fa   :  { %1301 = vmatpush3.msra.mxu0 %v1785_v55 }
 0x1fb   :  { %1302 = vmatprep.subr.mxu0 %v1789_v38 }
 0x1fc   :  { %1303 = vmatpush3.msra.mxu0 %v1789_v38 }
 0x1fd   :  { %1304 = vmatprep.subr.mxu0 %v1793_v32 }
 0x1fe   :  { %1305 = vmatpush3.msra.mxu0 %v1793_v32 }
 0x1ff   :  { %1306 = vmatprep.subr.mxu0 %v1798_v27 }
 0x200   :  { %1307 = vmatpush3.msra.mxu0 %v1798_v27 }
 0x201   :  { %1308 = vmatprep.subr.mxu0 %v1803_v13 }
 0x202   :  { %1309 = vmatpush3.msra.mxu0 %v1803_v13 }
 0x203   :  { %1310 = vmatprep.subr.mxu0 %v1808_v11 }
 0x204   :  { %1311 = vmatpush3.msra.mxu0 %v1808_v11 }
 0x205   :  { %1312 = vmatprep.subr.mxu0 %v1813_v61 }
 0x206   :  { %1313 = vmatpush3.msra.mxu0 %v1813_v61 }
 0x207   :  { %1314 = vmatprep.subr.mxu0 %v1818_v6 }
 0x208   :  { %1315 = vmatpush3.msra.mxu0 %v1818_v6 }
 0x209   :  { %1316 = vmatprep.subr.mxu0 %v1822_v15 }
 0x20a   :  { %1317 = vmatpush3.msra.mxu0 %v1822_v15 }
 0x20b   :  { %1318 = vmatprep.subr.mxu0 %v1826_v8 }
 0x20c   :  { %1319 = vmatpush3.msra.mxu0 %v1826_v8 }
 0x20d   :  { %1321 = vmatmul.mubr.bf16.vlgmr.msra.gmra.mxu0 %v1450_v5  ;;  %1160 = vmatprep.subr.mxu0 %v833_v4  ;;  %v830_v5 = vld [vmem:[%s2040_s3 + $0xe0] sm:$0xff] }
 0x20e   :  { %1324 = vmatprep.mubr.bf16.mxu0 %v1484_v14  ;;  %1161 = vmatpush3.msra.mxu0 %v817_v9  ;;  %v814_v14 = vld [vmem:[%s2040_s3 + $0x60] sm:$0xff] }
 0x20f   :  { %1162 = vmatprep.subr.mxu0 %v832_v63 }
 0x210   :  { %1163 = vmatpush3.msra.mxu0 %v816_v3 }
 0x211   :  { %1164 = vmatprep.subr.mxu0 %v831_v7 }
 0x212   :  { %1165 = vmatpush3.msra.mxu0 %v815_v31 }
 0x213   :  { %1166 = vmatprep.subr.mxu0 %v830_v5 }
 0x214   :  { %1167 = vmatpush3.msra.mxu0 %v814_v14 }
 0x215   :  { %1325 = vmatmul.mubr.bf16.gmra.mxu0 %v1505_v19  ;;  %1168 = vmatprep.subr.mxu0 %v829_v2  ;;  %v826_v19 = vld [vmem:[%s2040_s3 + $0xc0] sm:$0xff] }
 0x216   :  { %1328 = vmatprep.mubr.bf16.mxu0 %v1526_v24  ;;  %1169 = vmatpush3.msra.mxu0 %v813_v17  ;;  %v810_v24 = vld [vmem:[%s2040_s3 + $0x40] sm:$0xff] }
 0x217   :  { %1170 = vmatprep.subr.mxu0 %v828_v22 }
 0x218   :  { %1171 = vmatpush3.msra.mxu0 %v812_v50 }
 0x219   :  { %1172 = vmatprep.subr.mxu0 %v827_v45 }
 0x21a   :  { %1173 = vmatpush3.msra.mxu0 %v811_v46 }
 0x21b   :  { %1174 = vmatprep.subr.mxu0 %v826_v19 }
 0x21c   :  { %1175 = vmatpush3.msra.mxu0 %v810_v24 }
 0x21d   :  { %1329 = vmatmul.mubr.bf16.gmra.mxu0 %v1547_v29  ;;  %1176 = vmatprep.subr.mxu0 %v825_v21  ;;  %v822_v29 = vld [vmem:[%s2040_s3 + $0xa0] sm:$0xff] }
 0x21e   :  { %1332 = vmatprep.mubr.bf16.mxu0 %v1568_v34  ;;  %1177 = vmatpush3.msra.mxu0 %v809_v44  ;;  %v806_v34 = vld [vmem:[%s2040_s3 + $0x20] sm:$0xff] }
 0x21f   :  { %1178 = vmatprep.subr.mxu0 %v824_v40 }
 0x220   :  { %1179 = vmatpush3.msra.mxu0 %v808_v42 }
 0x221   :  { %1180 = vmatprep.subr.mxu0 %v823_v23 }
 0x222   :  { %1181 = vmatpush3.msra.mxu0 %v807_v39 }
 0x223   :  { %1182 = vmatprep.subr.mxu0 %v822_v29 }
 0x224   :  { %1183 = vmatpush3.msra.mxu0 %v806_v34 }
 0x225   :  { %1333 = vmatmul.mubr.bf16.gmra.mxu0 %v1579_v37  ;;  %1184 = vmatprep.subr.mxu0 %v821_v35  ;;  %v818_v37 = vld [vmem:[%s2040_s3 + $0x80] sm:$0xff] }
 0x226   :  { %1185 = vmatpush3.msra.mxu0 %v805_v26 }
 0x227   :  { %1186 = vmatprep.subr.mxu0 %v820_v0 }
 0x228   :  { %1187 = vmatpush3.msra.mxu0 %v804_v56 }
 0x229   :  { %1188 = vmatprep.subr.mxu0 %v819_v59 }
 0x22a   :  { %1189 = vmatpush3.msra.mxu0 %v803_v25 }
 0x22b   :  { %1190 = vmatprep.subr.mxu0 %v818_v37 }
 0x22c   :  { %1191 = vmatpush3.msra.mxu0 %v802_v28 }
 0x2cd   :  { %v1322_v4 = vpop.f32.mrf.mxu0 }
 0x2ce   :  { %v740_v14 = vmul.f32 %v1691_v51, %v1322_v4 }
 0x2cf   :  { %v675_v9 = vpop.f32.mrf.mxu0 }
 0x2d0   :  { %v738_v63 = vmul.f32 %v1686_v41, %v675_v9 }
 0x2d1   :  { %v1323_v3 = vpop.f32.mrf.mxu0 }
 0x2d2   :  { %905 = vmatprep.mubr.f32.mxu0 %v738_v63  ;;  %v741_v17 = vmul.f32 %v1696_v58, %v1323_v3 }
 0x2d3   :  { %v678_v7 = vpop.f32.mrf.mxu0  ;;  %906 = vmatmul.mubr.f32.vlgmr.msra.gmra.mxu0 %v1826_v8 }
 0x2d4   :  { %v739_v31 = vmul.f32 %v1689_v48, %v678_v7 }
 0x2d5   :  { %v1326_v5 = vpop.f32.mrf.mxu0 }
 0x2d6   :  { %910 = vmatprep.mubr.f32.mxu0 %v739_v31 }
 0x2d7   :  { %v691_v2 = vpop.f32.mrf.mxu0  ;;  %911 = vmatmul.mubr.f32.gmra.mxu0 %v1822_v15  ;;  %v744_v15 = vmul.f32 %v1708_v20, %v1326_v5 }
 0x2d8   :  { %915 = vmatprep.mubr.f32.mxu0 %v740_v14  ;;  %v742_v41 = vmul.f32 %v1699_v62, %v691_v2 }
 0x2d9   :  { %v1327_v22 = vpop.f32.mrf.mxu0 }
 0x2da   :  { %v745_v58 = vmul.f32 %v1712_v30, %v1327_v22 }
 0x2db   :  { %916 = vmatmul.mubr.f32.gmra.mxu0 %v1818_v6  ;;  %v694_v50 = vpop.f32.mrf.mxu0 }
 0x2dc   :  { %920 = vmatprep.mubr.f32.mxu0 %v741_v17  ;;  %v743_v48 = vmul.f32 %v1704_v10, %v694_v50 }
 0x2dd   :  { %v1330_v51 = vpop.f32.mrf.mxu0 }
 0x2de   :  { %v748_v20 = vmul.f32 %v1724_v47, %v1330_v51 }
 0x2df   :  { %921 = vmatmul.mubr.f32.gmra.mxu0 %v1813_v61  ;;  %v707_v8 = vpop.f32.mrf.mxu0 }
 0x2e0   :  { %925 = vmatprep.mubr.f32.mxu0 %v742_v41  ;;  %v746_v62 = vmul.f32 %v1715_v36, %v707_v8 }
 0x2e1   :  { %v1331_v6 = vpop.f32.mrf.mxu0 }
 0x2e2   :  { %v749_v30 = vmul.f32 %v1728_v53, %v1331_v6 }
 0x2e3   :  { %926 = vmatmul.mubr.f32.gmra.mxu0 %v1808_v11  ;;  %v710_v61 = vpop.f32.mrf.mxu0 }
 0x2e4   :  { %930 = vmatprep.mubr.f32.mxu0 %v743_v48  ;;  %v747_v10 = vmul.f32 %v1720_v43, %v710_v61 }
 0x2e5   :  { %v1334_v11 = vpop.f32.mrf.mxu0 }
 0x2e6   :  { %v752_v47 = vmul.f32 %v1740_v60, %v1334_v11 }
 0x2e7   :  { %931 = vmatmul.mubr.f32.gmra.mxu0 %v1803_v13  ;;  %v723_v13 = vpop.f32.mrf.mxu0 }
 0x2e8   :  { %935 = vmatprep.mubr.f32.mxu0 %v744_v15  ;;  %v750_v36 = vmul.f32 %v1731_v54, %v723_v13 }
 0x2eb   :  { %936 = vmatmul.mubr.f32.gmra.mxu0 %v1798_v27  ;;  %v1335_v27 = vpop.f32.mrf.mxu0 }
 0x2ec   :  { %940 = vmatprep.mubr.f32.mxu0 %v745_v58  ;;  %v753_v53 = vmul.f32 %v1744_v33, %v1335_v27 }
 0x2ef   :  { %941 = vmatmul.mubr.f32.gmra.mxu0 %v1793_v32  ;;  %v726_v32 = vpop.f32.mrf.mxu0 }
 0x2f0   :  { %945 = vmatprep.mubr.f32.mxu0 %v746_v62  ;;  %v751_v43 = vmul.f32 %v1736_v57, %v726_v32  ;;  %v1970_v57 = vld [vmem:[%s2041_s5] ss:$0 sm:$0xff] }
 0x2f3   :  { %946 = vmatmul.mubr.f32.gmra.mxu0 %v1789_v38 }
 0x2f4   :  { %950 = vmatprep.mubr.f32.mxu0 %v747_v10 }
 0x2f7   :  { %951 = vmatmul.mubr.f32.gmra.mxu0 %v1785_v55 }
 0x2f8   :  { %955 = vmatprep.mubr.f32.mxu0 %v748_v20 }
 0x2fb   :  { %956 = vmatmul.mubr.f32.gmra.mxu0 %v1781_v16 }
 0x2fc   :  { %960 = vmatprep.mubr.f32.mxu0 %v749_v30 }
 0x2ff   :  { %961 = vmatmul.mubr.f32.gmra.mxu0 %v1777_v49 }
 0x300   :  { %965 = vmatprep.mubr.f32.mxu0 %v750_v36 }
 0x303   :  { %966 = vmatmul.mubr.f32.gmra.mxu0 %v1773_v18 }
 0x304   :  { %970 = vmatprep.mubr.f32.mxu0 %v751_v43 }
 0x307   :  { %971 = vmatmul.mubr.f32.gmra.mxu0 %v1769_v52 }
 0x308   :  { %975 = vmatprep.mubr.f32.mxu0 %v752_v47 }
 0x30b   :  { %976 = vmatmul.mubr.f32.gmra.mxu0 %v1765_v1 }
 0x30c   :  { %980 = vmatprep.mubr.f32.mxu0 %v753_v53 }
 0x30f   :  { %981 = vmatmul.mubr.f32.gmra.mxu0 %v1763_v12 }
 0x393   :  { %v1192_v54 = vpop.f32.mrf.mxu0 }
 0x395   :  { %v1193_v18 = vpop.f32.mrf.mxu0 }
 0x396   :  { %v1194_v49 = vadd.f32 %v1193_v18, %v1192_v54 }
 0x397   :  { %v1195_v16 = vpop.f32.mrf.mxu0 }
 0x398   :  { %v908_v60 = vadd.f32 %v1194_v49, %v1970_v57 }
 0x399   :  { %v1196_v52 = vpop.f32.mrf.mxu0 }
 0x39a   :  { %v986_v55 = vmax.f32 %v908_v60, 0.0  ;;  %v1197_v38 = vadd.f32 %v1196_v52, %v1195_v16 }
 0x39b   :  { %v1198_v33 = vpop.f32.mrf.mxu0 }
 0x39c   :  { %1002 = vst [vmem:[%s2042_s6] sm:$0xff] %v986_v55  ;;  %v913_v12 = vadd.f32 %v1197_v38, %v1970_v57 }
 0x39d   :  { %v1199_v1 = vpop.f32.mrf.mxu0 }
 0x39e   :  { %v987_v45 = vmax.f32 %v913_v12, 0.0  ;;  %v1200_v46 = vadd.f32 %v1199_v1, %v1198_v33 }
 0x39f   :  { %v1201_v19 = vpop.f32.mrf.mxu0 }
 0x3a0   :  { %1003 = vst [vmem:[%s2042_s6 + $0x8] sm:$0xff] %v987_v45  ;;  %v918_v24 = vadd.f32 %v1200_v46, %v1970_v57 }
 0x3a1   :  { %v1202_v21 = vpop.f32.mrf.mxu0 }
 0x3a2   :  { %v988_v44 = vmax.f32 %v918_v24, 0.0  ;;  %v1203_v40 = vadd.f32 %v1202_v21, %v1201_v19 }
 0x3a3   :  { %v1204_v42 = vpop.f32.mrf.mxu0 }
 0x3a4   :  { %1004 = vst [vmem:[%s2042_s6 + $0x10] sm:$0xff] %v988_v44  ;;  %v923_v23 = vadd.f32 %v1203_v40, %v1970_v57 }
 0x3a5   :  { %v1205_v39 = vpop.f32.mrf.mxu0 }
 0x3a6   :  { %v989_v29 = vmax.f32 %v923_v23, 0.0  ;;  %v1206_v34 = vadd.f32 %v1205_v39, %v1204_v42 }
 0x3a7   :  { %v1207_v35 = vpop.f32.mrf.mxu0 }
 0x3a8   :  { %1005 = vst [vmem:[%s2042_s6 + $0x18] sm:$0xff] %v989_v29  ;;  %v928_v26 = vadd.f32 %v1206_v34, %v1970_v57 }
 0x3a9   :  { %v1208_v0 = vpop.f32.mrf.mxu0 }
 0x3aa   :  { %v990_v56 = vmax.f32 %v928_v26, 0.0  ;;  %v1209_v59 = vadd.f32 %v1208_v0, %v1207_v35 }
 0x3ab   :  { %v1210_v25 = vpop.f32.mrf.mxu0 }
 0x3ac   :  { %1006 = vst [vmem:[%s2042_s6 + $0x20] sm:$0xff] %v990_v56  ;;  %v933_v37 = vadd.f32 %v1209_v59, %v1970_v57 }
 0x3ad   :  { %v1211_v28 = vpop.f32.mrf.mxu0 }
 0x3ae   :  { %v991_v4 = vmax.f32 %v933_v37, 0.0  ;;  %v1212_v9 = vadd.f32 %v1211_v28, %v1210_v25 }
 0x3af   :  { %v1213_v63 = vpop.f32.mrf.mxu0 }
 0x3b0   :  { %1007 = vst [vmem:[%s2042_s6 + $0x28] sm:$0xff] %v991_v4  ;;  %v938_v3 = vadd.f32 %v1212_v9, %v1970_v57 }
 0x3b1   :  { %v1214_v7 = vpop.f32.mrf.mxu0 }
 0x3b2   :  { %v992_v31 = vmax.f32 %v938_v3, 0.0  ;;  %v1215_v5 = vadd.f32 %v1214_v7, %v1213_v63 }
 0x3b3   :  { %v1216_v14 = vpop.f32.mrf.mxu0 }
 0x3b4   :  { %1008 = vst [vmem:[%s2042_s6 + $0x30] sm:$0xff] %v992_v31  ;;  %v943_v2 = vadd.f32 %v1215_v5, %v1970_v57 }
 0x3b5   :  { %v1217_v17 = vpop.f32.mrf.mxu0 }
 0x3b6   :  { %v993_v22 = vmax.f32 %v943_v2, 0.0  ;;  %v1218_v41 = vadd.f32 %v1217_v17, %v1216_v14 }
 0x3b7   :  { %v1219_v50 = vpop.f32.mrf.mxu0 }
 0x3b8   :  { %1009 = vst [vmem:[%s2042_s6 + $0x38] sm:$0xff] %v993_v22  ;;  %v948_v48 = vadd.f32 %v1218_v41, %v1970_v57 }
 0x3b9   :  { %v1220_v51 = vpop.f32.mrf.mxu0 }
 0x3ba   :  { %v994_v15 = vmax.f32 %v948_v48, 0.0  ;;  %v1221_v8 = vadd.f32 %v1220_v51, %v1219_v50 }
 0x3bb   :  { %v1222_v58 = vpop.f32.mrf.mxu0 }
 0x3bc   :  { %1010 = vst [vmem:[%s2042_s6 + $0x40] sm:$0xff] %v994_v15  ;;  %v953_v6 = vadd.f32 %v1221_v8, %v1970_v57 }
 0x3bd   :  { %v1223_v62 = vpop.f32.mrf.mxu0 }
 0x3be   :  { %v995_v61 = vmax.f32 %v953_v6, 0.0  ;;  %v1224_v10 = vadd.f32 %v1223_v62, %v1222_v58 }
 0x3bf   :  { %v1225_v11 = vpop.f32.mrf.mxu0 }
 0x3c0   :  { %1011 = vst [vmem:[%s2042_s6 + $0x48] sm:$0xff] %v995_v61  ;;  %v958_v20 = vadd.f32 %v1224_v10, %v1970_v57 }
 0x3c1   :  { %v1226_v13 = vpop.f32.mrf.mxu0 }
 0x3c2   :  { %v996_v30 = vmax.f32 %v958_v20, 0.0  ;;  %v1227_v27 = vadd.f32 %v1226_v13, %v1225_v11 }
 0x3c3   :  { %v1228_v36 = vpop.f32.mrf.mxu0 }
 0x3c4   :  { %1012 = vst [vmem:[%s2042_s6 + $0x50] sm:$0xff] %v996_v30  ;;  %v963_v32 = vadd.f32 %v1227_v27, %v1970_v57 }
 0x3c5   :  { %v1229_v43 = vpop.f32.mrf.mxu0 }
 0x3c6   :  { %v997_v47 = vmax.f32 %v963_v32, 0.0  ;;  %v1230_v53 = vadd.f32 %v1229_v43, %v1228_v36 }
 0x3c7   :  { %v1231_v54 = vpop.f32.mrf.mxu0 }
 0x3c8   :  { %1013 = vst [vmem:[%s2042_s6 + $0x58] sm:$0xff] %v997_v47  ;;  %v968_v18 = vadd.f32 %v1230_v53, %v1970_v57 }
 0x3c9   :  { %v1232_v49 = vpop.f32.mrf.mxu0 }
 0x3ca   :  { %v998_v16 = vmax.f32 %v968_v18, 0.0  ;;  %v1233_v60 = vadd.f32 %v1232_v49, %v1231_v54 }
 0x3cb   :  { %v1234_v52 = vpop.f32.mrf.mxu0 }
 0x3cc   :  { %1014 = vst [vmem:[%s2042_s6 + $0x60] sm:$0xff] %v998_v16  ;;  %v973_v55 = vadd.f32 %v1233_v60, %v1970_v57 }
 0x3cd   :  { %v1235_v38 = vpop.f32.mrf.mxu0 }
 0x3ce   :  { %v999_v33 = vmax.f32 %v973_v55, 0.0  ;;  %v1236_v12 = vadd.f32 %v1235_v38, %v1234_v52 }
 0x3cf   :  { %v1237_v1 = vpop.f32.mrf.mxu0 }
 0x3d0   :  { %1015 = vst [vmem:[%s2042_s6 + $0x68] sm:$0xff] %v999_v33  ;;  %v978_v45 = vadd.f32 %v1236_v12, %v1970_v57 }
 0x3d1   :  { %v1238_v46 = vpop.f32.mrf.mxu0 }
 0x3d2   :  { %v1000_v19 = vmax.f32 %v978_v45, 0.0  ;;  %v1239_v24 = vadd.f32 %v1238_v46, %v1237_v1 }
 0x3d4   :  { %1016 = vst [vmem:[%s2042_s6 + $0x70] sm:$0xff] %v1000_v19  ;;  %v983_v21 = vadd.f32 %v1239_v24, %v1970_v57 }
 0x3d6   :  { %v1001_v44 = vmax.f32 %v983_v21, 0.0 }
 0x3d8   :  { %1017 = vst [vmem:[%s2042_s6 + $0x78] sm:$0xff] %v1001_v44 }

</bundles_post_ra>
